<compile_context>
chip_gen: v7x
topology: tpu7x:2x2x1
jax: 0.10.0
libtpu: 0.0.40
codegen_flags: <defaults>
</compile_context>

<pallas_src>
import jax
import jax.numpy as jnp
from jax.experimental import pallas as pl
from jax.experimental.pallas import tpu as pltpu

_LANE = 128
_VMEM_BUDGET = 48 * 1024 * 1024  # conservative: fits under v7x's 64 MiB / TC


def _round_up(n: int, m: int) -> int:
    return ((n + m - 1) // m) * m


def _default_mxu_dtype():
    # bf16 MXU operands are the fast path on v6e/v7x (f32 accumulation kept);
    # fall back to f32 elsewhere or if detection fails.
    try:
        kind = jax.devices()[0].device_kind.lower()
    except Exception:
        return jnp.float32
    if ("v6" in kind) or ("v7" in kind):
        return jnp.bfloat16
    return jnp.float32


def _mlp_kernel(x_ref, w1_ref, b1_ref, w2_ref, b2_ref, o_ref):
    # hidden = sigmoid(x @ W1 + b1)   (MXU matmul, f32 accumulation, EUP sigmoid)
    h = jnp.dot(x_ref[...], w1_ref[...], preferred_element_type=jnp.float32)
    h = jax.nn.sigmoid(h + b1_ref[...])
    # out = sigmoid(h @ W2 + b2)      (activations cast to MXU operand dtype)
    o = jnp.dot(h.astype(w2_ref.dtype), w2_ref[...],
                preferred_element_type=jnp.float32)
    o_ref[...] = jax.nn.sigmoid(o + b2_ref[...])


def prepare_params(w1, b1, w2, b2, *, mxu_dtype=None):
    """Pad/cast the parameters ONCE (hoisted out of the per-call path).

    w1: (input_size, h), b1: (h,), w2: (h, num_classes), b2: (num_classes,).
    Zero-padded W2 rows cancel the sigmoid(0)=0.5 values in padded hidden
    lanes, so lane-padding does not change the math.
    """
    if mxu_dtype is None:
        mxu_dtype = _default_mxu_dtype()
    input_size, h_dim = w1.shape
    num_classes = w2.shape[1]
    kp = _round_up(input_size, _LANE)
    hp = _round_up(h_dim, _LANE)
    cp = _round_up(num_classes, _LANE)

    w1_pad = jnp.pad(w1.astype(jnp.float32),
                     ((0, kp - input_size), (0, hp - h_dim))).astype(mxu_dtype)
    b1_pad = jnp.pad(b1.astype(jnp.float32), (0, hp - h_dim)).reshape(1, hp)
    w2_pad = jnp.pad(w2.astype(jnp.float32),
                     ((0, hp - h_dim), (0, cp - num_classes))).astype(mxu_dtype)
    b2_pad = jnp.pad(b2.astype(jnp.float32), (0, cp - num_classes)).reshape(1, cp)

    return dict(w1=w1_pad, b1=b1_pad, w2=w2_pad, b2=b2_pad,
                input_size=input_size, num_classes=num_classes,
                mxu_dtype=mxu_dtype)


def _footprint_bytes(tile_m, kp, hp, cp, itemsize):
    # Double-buffered x and out blocks + grid-invariant weights/biases
    # (weights counted 2x for v7x per-core duplication headroom).
    return (2 * tile_m * kp * itemsize + 2 * tile_m * cp * 4
            + 2 * (kp * hp * itemsize + hp * cp * itemsize + hp * 4 + cp * 4))


def _choose_tile_m(B, sublane, kp, hp, cp, itemsize):
    """Large tiles (>=128 amortize ~0.35us/step), capped at 512 and by VMEM,
    but >= 2 grid steps when B allows so both v7x TensorCores get work."""
    if B <= sublane:
        tile = _round_up(B, sublane)
    else:
        half = -(-B // 2)
        tile = min(512, _round_up(half, sublane))
    while tile > sublane and _footprint_bytes(tile, kp, hp, cp, itemsize) > _VMEM_BUDGET:
        tile = _round_up(tile // 2, sublane)
    return tile


def nn_forward_batched(xb, params):
    """Batched MLP: xb is (B, input_size) of already-flattened samples.
    Returns (B, num_classes) float32."""
    B, input_size = xb.shape
    assert input_size == params["input_size"], "input_size mismatch"
    w1_pad, b1_pad = params["w1"], params["b1"]
    w2_pad, b2_pad = params["w2"], params["b2"]
    mxu_dtype = params["mxu_dtype"]
    num_classes = params["num_classes"]
    kp, hp = w1_pad.shape
    cp = w2_pad.shape[1]
    itemsize = jnp.dtype(mxu_dtype).itemsize
    sublane = 16 if itemsize == 2 else 8  # bf16 packs (16,128) per vreg

    tile_m = _choose_tile_m(B, sublane, kp, hp, cp, itemsize)
    mp = _round_up(B, tile_m)

    # VMEM guard for the untiled-K/untiled-N design.
    # TODO(synk): add a K ("arbitrary", last) reduction grid axis with an f32
    # accumulator scratch if input_size/hidden ever grow past this budget.
    assert _footprint_bytes(tile_m, kp, hp, cp, itemsize) <= _VMEM_BUDGET, (
        "weights + tiles exceed VMEM budget; tile K/N explicitly")

    # Single pad op for x (per-call); weights are already padded/cast.
    x_pad = jnp.pad(xb.astype(mxu_dtype), ((0, mp - B), (0, kp - input_size)))

    grid = (mp // tile_m,)
    vmem = pltpu.MemorySpace.VMEM

    cost = pl.CostEstimate(
        flops=2 * mp * kp * hp + 2 * mp * hp * cp,
        transcendentals=mp * (hp + cp),
        bytes_accessed=(itemsize * (mp * kp + kp * hp + hp * cp)
                        + 4 * (hp + cp + mp * cp)),
    )

    out = pl.pallas_call(
        _mlp_kernel,
        out_shape=jax.ShapeDtypeStruct((mp, cp), jnp.float32),
        grid=grid,
        in_specs=[
            pl.BlockSpec((tile_m, kp), lambda i: (i, 0), memory_space=vmem),
            pl.BlockSpec((kp, hp), lambda i: (0, 0), memory_space=vmem),
            pl.BlockSpec((1, hp), lambda i: (0, 0), memory_space=vmem),
            pl.BlockSpec((hp, cp), lambda i: (0, 0), memory_space=vmem),
            pl.BlockSpec((1, cp), lambda i: (0, 0), memory_space=vmem),
        ],
        out_specs=pl.BlockSpec((tile_m, cp), lambda i: (i, 0), memory_space=vmem),
        compiler_params=pltpu.CompilerParams(
            dimension_semantics=("parallel",),
            vmem_limit_bytes=_VMEM_BUDGET),
        cost_estimate=cost,
    )(x_pad, w1_pad, b1_pad, w2_pad, b2_pad)

    # NOTE: if the consumer can take the lane-dense (mp, cp) slab (or the
    # argmax/loss is fused into the epilogue), skip this strided slice.
    return out[:B, :num_classes]


def nn_forward(x, params):
    """Faithful NN.forward: flatten x (torch .view(-1)), two Linear+sigmoid.
    Returns (num_classes,) float32.

    NOTE (perf): at B=1 this is pure launch/pad overhead — batch requests
    through nn_forward_batched whenever possible."""
    input_size = params["input_size"]
    num_classes = params["num_classes"]
    x_row = x.astype(jnp.float32).reshape(1, input_size)
    return nn_forward_batched(x_row, params).reshape(num_classes)


if __name__ == "__main__":
    # Shapes consistent with the module: a (4, 16) sample flattens to
    # input_size = 64; hidden = input_size // 2 = 32; num_classes = 8.
    input_size = 64
    num_classes = 8
    hidden = input_size // 2

    key = jax.random.PRNGKey(0)
    kx, kw1, kb1, kw2, kb2, kxb, kxc = jax.random.split(key, 7)

    x = jax.random.normal(kx, (4, 16), dtype=jnp.float32)  # flattens to 64
    lim1 = 1.0 / (input_size ** 0.5)
    lim2 = 1.0 / (hidden ** 0.5)
    w1 = jax.random.uniform(kw1, (input_size, hidden), jnp.float32, -lim1, lim1)
    b1 = jax.random.uniform(kb1, (hidden,), jnp.float32, -lim1, lim1)
    w2 = jax.random.uniform(kw2, (hidden, num_classes), jnp.float32, -lim2, lim2)
    b2 = jax.random.uniform(kb2, (num_classes,), jnp.float32, -lim2, lim2)

    # Parameters padded/cast ONCE (hoisted out of the forward path).
    params_f32 = prepare_params(w1, b1, w2, b2, mxu_dtype=jnp.float32)
    params_auto = prepare_params(w1, b1, w2, b2)  # bf16 on v6e/v7x, else f32

    # 1) Single-sample path — exact semantics of NN.forward (f32 everywhere).
    out = nn_forward(x, params_f32)
    jax.block_until_ready(out)
    ref_h = jax.nn.sigmoid(x.reshape(-1) @ w1 + b1)
    ref_o = jax.nn.sigmoid(ref_h @ w2 + b2)
    assert out.shape == (num_classes,)
    assert jnp.allclose(out, ref_o, atol=1e-5, rtol=1e-5)

    # 2) Batched path, f32 operands, B=16 (grid of >=2 steps for v7x megacore).
    xb = jax.random.normal(kxb, (16, input_size), dtype=jnp.float32)
    ref_b = jax.nn.sigmoid(jax.nn.sigmoid(xb @ w1 + b1) @ w2 + b2)
    out_b = nn_forward_batched(xb, params_f32)
    jax.block_until_ready(out_b)
    assert out_b.shape == (16, num_classes)
    assert jnp.allclose(out_b, ref_b, atol=1e-4, rtol=1e-4)

    # 3) Batched path with auto (bf16-on-v6e/v7x) operands; f32 accumulation,
    #    looser tolerance covers both the bf16 and f32-fallback cases.
    out_a = nn_forward_batched(xb, params_auto)
    jax.block_until_ready(out_a)
    assert jnp.allclose(out_a, ref_b, atol=3e-2, rtol=3e-2)

    # 4) Non-multiple batch (exercises M/lane padding + tile_m selection).
    xc = jax.random.normal(kxc, (300, input_size), dtype=jnp.float32)
    ref_c = jax.nn.sigmoid(jax.nn.sigmoid(xc @ w1 + b1) @ w2 + b2)
    out_c = nn_forward_batched(xc, params_f32)
    jax.block_until_ready(out_c)
    assert out_c.shape == (300, num_classes)
    assert jnp.allclose(out_c, ref_c, atol=1e-4, rtol=1e-4)

    print("KERNEL_OK")
</pallas_src>

<mosaic_0001>
module attributes {stable_mosaic.version = 11 : i64} {
  func.func @_mlp_kernel(%arg0: i32, %arg1: memref<8x128xf32, #tpu.memory_space<vmem>>, %arg2: memref<128x128xf32, #tpu.memory_space<vmem>>, %arg3: memref<1x128xf32, #tpu.memory_space<vmem>>, %arg4: memref<128x128xf32, #tpu.memory_space<vmem>>, %arg5: memref<1x128xf32, #tpu.memory_space<vmem>>, %arg6: memref<8x128xf32, #tpu.memory_space<vmem>>) attributes {dimension_semantics = [#tpu.dimension_semantics<parallel>], iteration_bounds = array<i64: 1>, scalar_prefetch = 0 : i64, scratch_operands = 0 : i64, tpu.core_type = #tpu.core_type<tc>, window_params = [{transform_indices = @transform_0, window_bounds = array<i64: 8, 128>}, {pipeline_mode = #tpu.pipeline_mode<synchronous>, transform_indices = @transform_1, window_bounds = array<i64: 128, 128>}, {pipeline_mode = #tpu.pipeline_mode<synchronous>, transform_indices = @transform_2, window_bounds = array<i64: 1, 128>}, {pipeline_mode = #tpu.pipeline_mode<synchronous>, transform_indices = @transform_3, window_bounds = array<i64: 128, 128>}, {pipeline_mode = #tpu.pipeline_mode<synchronous>, transform_indices = @transform_4, window_bounds = array<i64: 1, 128>}, {transform_indices = @transform_5, window_bounds = array<i64: 8, 128>}]} {
    %c0 = arith.constant 0 : index
    %c0_0 = arith.constant 0 : index
    %0 = vector.load %arg1[%c0, %c0_0] : memref<8x128xf32, #tpu.memory_space<vmem>>, vector<8x128xf32>
    %c0_1 = arith.constant 0 : index
    %c0_2 = arith.constant 0 : index
    %1 = vector.load %arg2[%c0_1, %c0_2] : memref<128x128xf32, #tpu.memory_space<vmem>>, vector<128x128xf32>
    %cst = arith.constant dense<0.000000e+00> : vector<8x128xf32>
    %2 = tpu.matmul %0, %1, %cst {dimension_numbers = #tpu.dot_dimension_numbers<[1], [0], [0], [1], [0, 0, 1, 1], [], []>} : vector<8x128xf32>, vector<128x128xf32>, vector<8x128xf32> -> vector<8x128xf32>
    %c0_3 = arith.constant 0 : index
    %c0_4 = arith.constant 0 : index
    %3 = vector.load %arg3[%c0_3, %c0_4] : memref<1x128xf32, #tpu.memory_space<vmem>>, vector<1x128xf32>
    %4 = vector.broadcast %3 : vector<1x128xf32> to vector<8x128xf32>
    %5 = arith.addf %2, %4 : vector<8x128xf32>
    %6 = arith.negf %5 : vector<8x128xf32>
    %7 = math.exp %6 : vector<8x128xf32>
    %cst_5 = arith.constant 1.000000e+00 : f32
    %8 = vector.broadcast %cst_5 : f32 to vector<8x128xf32>
    %9 = arith.addf %8, %7 : vector<8x128xf32>
    %10 = arith.divf %8, %9 : vector<8x128xf32>
    %c0_6 = arith.constant 0 : index
    %c0_7 = arith.constant 0 : index
    %11 = vector.load %arg4[%c0_6, %c0_7] : memref<128x128xf32, #tpu.memory_space<vmem>>, vector<128x128xf32>
    %cst_8 = arith.constant dense<0.000000e+00> : vector<8x128xf32>
    %12 = tpu.matmul %10, %11, %cst_8 {dimension_numbers = #tpu.dot_dimension_numbers<[1], [0], [0], [1], [0, 0, 1, 1], [], []>} : vector<8x128xf32>, vector<128x128xf32>, vector<8x128xf32> -> vector<8x128xf32>
    %c0_9 = arith.constant 0 : index
    %c0_10 = arith.constant 0 : index
    %13 = vector.load %arg5[%c0_9, %c0_10] : memref<1x128xf32, #tpu.memory_space<vmem>>, vector<1x128xf32>
    %14 = vector.broadcast %13 : vector<1x128xf32> to vector<8x128xf32>
    %15 = arith.addf %12, %14 : vector<8x128xf32>
    %16 = arith.negf %15 : vector<8x128xf32>
    %17 = math.exp %16 : vector<8x128xf32>
    %cst_11 = arith.constant 1.000000e+00 : f32
    %18 = vector.broadcast %cst_11 : f32 to vector<8x128xf32>
    %19 = arith.addf %18, %17 : vector<8x128xf32>
    %20 = arith.divf %18, %19 : vector<8x128xf32>
    %c0_12 = arith.constant 0 : index
    %c0_13 = arith.constant 0 : index
    %21 = vector.load %arg6[%c0_12, %c0_13] : memref<8x128xf32, #tpu.memory_space<vmem>>, vector<8x128xf32>
    tpu.vector_store %arg6[%c0_12, %c0_13], %20 {strides = array<i32>} : memref<8x128xf32, #tpu.memory_space<vmem>>, vector<8x128xf32>,
    return
  }
  func.func @transform_0(%arg0: i32) -> (i32, i32) {
    %c0_i32 = arith.constant 0 : i32
    %c0_i32_0 = arith.constant 0 : i32
    return %arg0, %c0_i32 : i32, i32
  }
  func.func @transform_1(%arg0: i32) -> (i32, i32) {
    %c0_i32 = arith.constant 0 : i32
    %c0_i32_0 = arith.constant 0 : i32
    %c0_i32_1 = arith.constant 0 : i32
    return %c0_i32, %c0_i32_0 : i32, i32
  }
  func.func @transform_2(%arg0: i32) -> (i32, i32) {
    %c0_i32 = arith.constant 0 : i32
    %c0_i32_0 = arith.constant 0 : i32
    %c0_i32_1 = arith.constant 0 : i32
    return %c0_i32, %c0_i32_0 : i32, i32
  }
  func.func @transform_3(%arg0: i32) -> (i32, i32) {
    %c0_i32 = arith.constant 0 : i32
    %c0_i32_0 = arith.constant 0 : i32
    %c0_i32_1 = arith.constant 0 : i32
    return %c0_i32, %c0_i32_0 : i32, i32
  }
  func.func @transform_4(%arg0: i32) -> (i32, i32) {
    %c0_i32 = arith.constant 0 : i32
    %c0_i32_0 = arith.constant 0 : i32
    %c0_i32_1 = arith.constant 0 : i32
    return %c0_i32, %c0_i32_0 : i32, i32
  }
  func.func @transform_5(%arg0: i32) -> (i32, i32) {
    %c0_i32 = arith.constant 0 : i32
    %c0_i32_0 = arith.constant 0 : i32
    return %arg0, %c0_i32 : i32, i32
  }
}

</mosaic_0001>

<bundles_post_ra>
// kernel: tpu_custom_call.1
= control target key start
LH: loop header
LB: loop body
LE: loop exit
PB: predicated region body
PF: predicated region fallthrough
CT: control target
= control target key end

     0   :  { %10 = vsyncpa [#allocation3], 0  ;;  %s658_s0 = inlined_call_operand.hbm [shape: f32[8,128], index: 0, kind: input, shape index: {}]   ;;  %s659_s1 = inlined_call_operand.hbm [shape: f32[128,128], index: 1, kind: input, shape index: {}]   ;;  %s660_s2 = inlined_call_operand.vmem [shape: f32[1,128], index: 2, kind: input, shape index: {}]   ;;  %s661_s3 = inlined_call_operand.hbm [shape: f32[128,128], index: 3, kind: input, shape index: {}]   ;;  %s662_s4 = inlined_call_operand.vmem [shape: f32[1,128], index: 4, kind: input, shape index: {}]   ;;  %s663_s5 = inlined_call_operand.hbm [shape: f32[8,128], index: 5, kind: output, shape index: {}]  }
   0x1   :  { %11 = vsyncpa [#allocation6], 0 }
   0x2   :  { %12 = vsyncpa [#allocation4], 0  ;;  %s543_s18 = smov [#allocation5]   ;;  %s449_s22 = scalar_lea.hbm %s659_s1, 2048 }
   0x3   :  { %s28_s19 = sshll.u32 %s543_s18, 4  ;;  %p450_p0 = scmp.ne.s32.totalorder %s659_s1, %s449_s22  ;;  %s29_s19 = int_to_ptr.vmem [resolvable:$true] %s28_s19 }
   0x4   :  { %p453_p1 = scmp.lt.u32.totalorder %s449_s22, %s659_s1 }
   0x6   :  { %p455_p2 = pnand %p453_p1, %p450_p0 }
   0x8   :  { %458 = shalt.err (!%p455_p2)
}
   0x9   :  { %s459_s27 = scalar_lea.vmem %s29_s19, 2048  ;;  %p464_p4 = scmp.lt.s32.totalorder %s29_s19, %s29_s19 }
   0xa   :  { %p460_p3 = scmp.ne.s32.totalorder %s29_s19, %s459_s27  ;;  %p465_p5 = scmp.lt.s32.totalorder %s459_s27, %s459_s27 }
   0xc   :  { %p466_p6 = por %p465_p5, %p464_p4 }
   0xe   :  { %p467_p7 = pnand %p466_p6, %p460_p3 }
  0x10   :  { %470 = shalt.err (!%p467_p7)
}
  0x11   :  { %s544_s28 = smov 128   ;;  %s545_s29 = smov 8  }
  0x12   :  { %34 = dma.hbm_to_vmem [thread:$0]  %s659_s1, 2048, %s29_s19, [#allocation6], %s544_s28, %s544_s28, %s545_s29  }
  0x13   :  { %s546_s7 = smov [#allocation2]   ;;  %s547_s9 = smov [#allocation7]  }
  0x14   :  { %s19_s8 = sshll.u32 %s546_s7, 4  ;;  %s42_s10 = sshll.u32 %s547_s9, 4  ;;  %s20_s8 = int_to_ptr.vmem [resolvable:$true] %s19_s8  ;;  %s43_s10 = int_to_ptr.vmem [resolvable:$true] %s42_s10 }
  0x15   :  { %s471_s13 = scalar_lea.hbm %s658_s0, 128 }
  0x16   :  { %p472_p8 = scmp.ne.s32.totalorder %s658_s0, %s471_s13  ;;  %p475_p9 = scmp.lt.u32.totalorder %s471_s13, %s658_s0 }
  0x18   :  { %p477_p10 = pnand %p475_p9, %p472_p8 }
  0x1a   :  { %480 = shalt.err (!%p477_p10)
}
  0x1b   :  { %s481_s1 = scalar_lea.vmem %s20_s8, 128  ;;  %p486_p12 = scmp.lt.s32.totalorder %s20_s8, %s20_s8 }
  0x1c   :  { %p482_p11 = scmp.ne.s32.totalorder %s20_s8, %s481_s1  ;;  %p487_p13 = scmp.lt.s32.totalorder %s481_s1, %s481_s1 }
  0x1e   :  { %p488_p0 = por %p487_p13, %p486_p12 }
  0x20   :  { %p489_p1 = pnand %p488_p0, %p482_p11 }
  0x22   :  { %492 = shalt.err (!%p489_p1)
}
  0x23   :  { %22 = dma.hbm_to_vmem [thread:$0]  %s658_s0, 128, %s20_s8, [#allocation3]  }
  0x24   :  { %s493_s22 = scalar_lea.hbm %s661_s3, 2048 }
  0x25   :  { %p494_p2 = scmp.ne.s32.totalorder %s661_s3, %s493_s22  ;;  %p497_p3 = scmp.lt.u32.totalorder %s493_s22, %s661_s3 }
  0x27   :  { %p499_p4 = pnand %p497_p3, %p494_p2 }
  0x29   :  { %502 = shalt.err (!%p499_p4)
}
  0x2a   :  { %s503_s27 = scalar_lea.vmem %s43_s10, 2048  ;;  %p508_p6 = scmp.lt.s32.totalorder %s43_s10, %s43_s10 }
  0x2b   :  { %p504_p5 = scmp.ne.s32.totalorder %s43_s10, %s503_s27  ;;  %p509_p7 = scmp.lt.s32.totalorder %s503_s27, %s503_s27 }
  0x2d   :  { %p510_p8 = por %p509_p7, %p508_p6 }
  0x2f   :  { %p511_p9 = pnand %p510_p8, %p504_p5 }
  0x31   :  { %514 = shalt.err (!%p511_p9)
}
  0x32   :  { %48 = dma.hbm_to_vmem [thread:$0]  %s661_s3, 2048, %s43_s10, [#allocation6], %s544_s28, %s544_s28, %s545_s29  }
  0x33   :  { %537 = dma.done.wait [#allocation3], 128  }
  0x34   :  { %538 = vsyncadd [#allocation3], 4294967168 }
  0x35   :  { %539 = dma.done.wait [#allocation6], 4096  }
  0x36   :  { %540 = vsyncadd [#allocation6], 4294963200  ;;  %v548_v0 = vmov 0.0|0.0   ;;  %vm549_vm0 = vmmov 0   ;;  %v550_v1 = vmov 0.0   ;;  %v61_v2 = vld [vmem:[#allocation5] sm:$0xff] }
  0x37   :  { %384 = vmatprep.subr.bf16.mxu0 %v548_v0  ;;  %346 = vmatprep.mubr.msk.f32.mxu0 %vm549_vm0, %v550_v1  ;;  %v62_v3 = vld [vmem:[#allocation5 + $0x8] sm:$0xff]  ;;  %v63_v4 = vld [vmem:[#allocation5 + $0x10] sm:$0xff]  ;;  %v64_v6 = vld [vmem:[#allocation5 + $0x18] sm:$0xff] }
  0x38   :  { %408 = vmatprep.subr.bf16.mxu1 %v548_v0  ;;  %381 = vmatprep.mubr.msk.f32.mxu1 %vm549_vm0, %v550_v1  ;;  %v385_v5 = vpack.c.bf16 %v62_v3, %v61_v2  ;;  %v388_v7 = vpack.c.bf16 %v64_v6, %v63_v4  ;;  %v65_v8 = vld [vmem:[#allocation5 + $0x20] sm:$0xff]  ;;  %v66_v9 = vld [vmem:[#allocation5 + $0x28] sm:$0xff]  ;;  %v67_v14 = vld [vmem:[#allocation5 + $0x30] sm:$0xff] }
  0x39   :  { %v160_v10 = vld [vmem:[#allocation7] sm:$0xff]  ;;  %v161_v11 = vld [vmem:[#allocation7 + $0x8] sm:$0xff]  ;;  %v391_v12 = vpack.c.bf16 %v66_v9, %v65_v8  ;;  %v68_v15 = vld [vmem:[#allocation5 + $0x38] sm:$0xff] }
  0x3a   :  { %386 = vmatpush3.bf16.msra.mxu0 %v385_v5  ;;  %v409_v13 = vpack.c.bf16 %v161_v11, %v160_v10  ;;  %v394_v16 = vpack.c.bf16 %v68_v15, %v67_v14  ;;  %v69_v17 = vld [vmem:[#allocation5 + $0x40] sm:$0xff]  ;;  %v70_v18 = vld [vmem:[#allocation5 + $0x48] sm:$0xff]  ;;  %v71_v20 = vld [vmem:[#allocation5 + $0x50] sm:$0xff] }
  0x3b   :  { %387 = vmatprep.subr.bf16.mxu0 %v548_v0  ;;  %v397_v19 = vpack.c.bf16 %v70_v18, %v69_v17  ;;  %v72_v21 = vld [vmem:[#allocation5 + $0x58] sm:$0xff]  ;;  %v73_v23 = vld [vmem:[#allocation5 + $0x60] sm:$0xff]  ;;  %v74_v24 = vld [vmem:[#allocation5 + $0x68] sm:$0xff] }
  0x3c   :  { %410 = vmatpush3.bf16.msra.mxu1 %v409_v13  ;;  %v400_v22 = vpack.c.bf16 %v72_v21, %v71_v20  ;;  %v403_v25 = vpack.c.bf16 %v74_v24, %v73_v23  ;;  %v75_v26 = vld [vmem:[#allocation5 + $0x70] sm:$0xff]  ;;  %v76_v27 = vld [vmem:[#allocation5 + $0x78] sm:$0xff]  ;;  %v164_v33 = vld [vmem:[#allocation7 + $0x20] sm:$0xff] }
  0x3d   :  { %411 = vmatprep.subr.bf16.mxu1 %v548_v0  ;;  %v406_v28 = vpack.c.bf16 %v76_v27, %v75_v26  ;;  %v60_v29 = vld [vmem:[#allocation2] sm:$0xff]  ;;  %v162_v30 = vld [vmem:[#allocation7 + $0x10] sm:$0xff]  ;;  %v165_v34 = vld [vmem:[#allocation7 + $0x28] sm:$0xff] }
  0x3e   :  { %389 = vmatpush3.bf16.msra.mxu0 %v388_v7  ;;  %v163_v31 = vld [vmem:[#allocation7 + $0x18] sm:$0xff]  ;;  %v415_v35 = vpack.c.bf16 %v165_v34, %v164_v33  ;;  %v166_v36 = vld [vmem:[#allocation7 + $0x30] sm:$0xff]  ;;  %v168_v39 = vld [vmem:[#allocation7 + $0x40] sm:$0xff] }
  0x3f   :  { %390 = vmatprep.subr.bf16.mxu0 %v548_v0  ;;  %v412_v32 = vpack.c.bf16 %v163_v31, %v162_v30  ;;  %v167_v37 = vld [vmem:[#allocation7 + $0x38] sm:$0xff]  ;;  %v169_v40 = vld [vmem:[#allocation7 + $0x48] sm:$0xff]  ;;  %v170_v42 = vld [vmem:[#allocation7 + $0x50] sm:$0xff] }
  0x40   :  { %v418_v38 = vpack.c.bf16 %v167_v37, %v166_v36  ;;  %v421_v41 = vpack.c.bf16 %v169_v40, %v168_v39  ;;  %v171_v43 = vld [vmem:[#allocation7 + $0x58] sm:$0xff]  ;;  %v172_v45 = vld [vmem:[#allocation7 + $0x60] sm:$0xff]  ;;  %v173_v46 = vld [vmem:[#allocation7 + $0x68] sm:$0xff] }
  0x41   :  { %413 = vmatpush3.bf16.msra.mxu1 %v412_v32  ;;  %v424_v44 = vpack.c.bf16 %v171_v43, %v170_v42  ;;  %v427_v47 = vpack.c.bf16 %v173_v46, %v172_v45  ;;  %v174_v48 = vld [vmem:[#allocation7 + $0x70] sm:$0xff]  ;;  %v175_v49 = vld [vmem:[#allocation7 + $0x78] sm:$0xff] }
  0x42   :  { %392 = vmatpush3.bf16.msra.mxu0 %v391_v12  ;;  %414 = vmatprep.subr.bf16.mxu1 %v548_v0  ;;  %v430_v50 = vpack.c.bf16 %v175_v49, %v174_v48  ;;  %v276_v51 = vld [vmem:[%s660_s2] ss:$0 sm:$0xff]  ;;  %s551_s2 = smov [#allocation8]  }
  0x43   :  { %393 = vmatprep.subr.bf16.mxu0 %v548_v0  ;;  %v278_v59 = vld [vmem:[%s662_s4] ss:$0 sm:$0xff]  ;;  %s266_s7 = sshll.u32 %s551_s2, 4  ;;  %s267_s7 = int_to_ptr.vmem [resolvable:$true] %s266_s7 }
  0x44   :  { %s515_s8 = scalar_lea.vmem %s267_s7, 128  ;;  %p520_p11 = scmp.lt.s32.totalorder %s267_s7, %s267_s7 }
  0x45   :  { %416 = vmatpush3.bf16.msra.mxu1 %v415_v35  ;;  %p516_p10 = scmp.ne.s32.totalorder %s267_s7, %s515_s8  ;;  %p521_p12 = scmp.lt.s32.totalorder %s515_s8, %s515_s8 }
  0x46   :  { %395 = vmatpush3.bf16.msra.mxu0 %v394_v16  ;;  %417 = vmatprep.subr.bf16.mxu1 %v548_v0 }
  0x47   :  { %396 = vmatprep.subr.bf16.mxu0 %v548_v0  ;;  %p522_p13 = por %p521_p12, %p520_p11 }
  0x49   :  { %419 = vmatpush3.bf16.msra.mxu1 %v418_v38  ;;  %p523_p0 = pnand %p522_p13, %p516_p10 }
  0x4a   :  { %398 = vmatpush3.bf16.msra.mxu0 %v397_v19  ;;  %420 = vmatprep.subr.bf16.mxu1 %v548_v0 }
  0x4b   :  { %399 = vmatprep.subr.bf16.mxu0 %v548_v0 }
  0x4d   :  { %422 = vmatpush3.bf16.msra.mxu1 %v421_v41 }
  0x4e   :  { %401 = vmatpush3.bf16.msra.mxu0 %v400_v22  ;;  %423 = vmatprep.subr.bf16.mxu1 %v548_v0 }
  0x4f   :  { %402 = vmatprep.subr.bf16.mxu0 %v548_v0 }
  0x51   :  { %425 = vmatpush3.bf16.msra.mxu1 %v424_v44 }
  0x52   :  { %404 = vmatpush3.bf16.msra.mxu0 %v403_v25  ;;  %426 = vmatprep.subr.bf16.mxu1 %v548_v0 }
  0x53   :  { %405 = vmatprep.subr.bf16.mxu0 %v548_v0 }
  0x55   :  { %428 = vmatpush3.bf16.msra.mxu1 %v427_v47 }
  0x56   :  { %407 = vmatpush3.bf16.msra.mxu0 %v406_v28  ;;  %429 = vmatprep.subr.bf16.mxu1 %v548_v0 }
  0x59   :  { %347 = vmatmul.mubr.f32.vlgmr.msra.gmra.mrb[0].mxu0 %v60_v29  ;;  %431 = vmatpush3.bf16.msra.mxu1 %v430_v50 }
 0x12c   :  { %v150_v52 = vpop.f32.mrb[0].mxu0 }
 0x12d   :  { %v151_v53 = vadd.f32 %v276_v51, %v150_v52  ;;  %v348_v54 = vpop.f32.mrb[1].mxu0 }
 0x12f   :  { %v277_v55 = vmul.f32 -1.442695, %v151_v53 }
 0x131   :  { %441 = vpow2.f32 %v277_v55 }
 0x13b   :  { %v442_v56 = vpop.eup %441 }
 0x13c   :  { %v157_v57 = vadd.f32 1.0, %v442_v56 }
 0x13e   :  { %443 = vrcp.f32 %v157_v57 }
 0x148   :  { %v444_v58 = vpop.eup %443 }
 0x149   :  { %382 = vmatmul.mubr.f32.vlgmr.msra.gmra.mrb[0].mxu1 %v444_v58 }
 0x21c   :  { %v249_v60 = vpop.f32.mrb[0].mxu1 }
 0x21d   :  { %v250_v61 = vadd.f32 %v278_v59, %v249_v60  ;;  %v383_v62 = vpop.f32.mrb[1].mxu1 }
 0x21f   :  { %v279_v63 = vmul.f32 -1.442695, %v250_v61 }
 0x221   :  { %445 = vpow2.f32 %v279_v63 }
 0x22b   :  { %v446_v0 = vpop.eup %445 }
 0x22c   :  { %v256_v1 = vadd.f32 1.0, %v446_v0 }
 0x22e   :  { %447 = vrcp.f32 %v256_v1 }
 0x238   :  { %v448_v2 = vpop.eup %447 }
 0x239   :  { %259 = vst [vmem:[#allocation8] sm:$0xff] %v448_v2 }
 0x23a   :  { %526 = shalt.err (!%p523_p0)
}
 0x23b   :  { %s527_s10 = scalar_lea.hbm %s663_s5, 128 }
 0x23c   :  { %p528_p1 = scmp.ne.s32.totalorder %s663_s5, %s527_s10  ;;  %p531_p2 = scmp.lt.u32.totalorder %s527_s10, %s663_s5 }
 0x23e   :  { %p533_p3 = pnand %p531_p2, %p528_p1 }
 0x240   :  { %536 = shalt.err (!%p533_p3)
}
 0x241   :  { %269 = dma.vmem_to_hbm [thread:$0]  %s267_s7, 128, %s663_s5, [#allocation4]  }
 0x242   :  { %541 = dma.done.wait [#allocation4], 128  }
 0x243   :  { %542 = vsyncadd [#allocation4], 4294967168 }
 0x244   :  { %273 = vsyncpa [#allocation3], 1 }
 0x245   :  { %274 = vsyncpa [#allocation6], 1 }
 0x246   :  { %275 = vsyncpa [#allocation4], 1 }

</bundles_post_ra>
